<compile_context>
chip_gen: v7x
topology: tpu7x:2x2x1
jax: 0.10.0
libtpu: 0.0.40
codegen_flags: <defaults>
</compile_context>

<pallas_src>
import functools

import jax
import jax.numpy as jnp
from jax.experimental import pallas as pl
from jax.experimental.pallas import tpu as pltpu


_TB_MAX = 512          # batch tile for the batch-tiled grid path (large B)


def _round_up(n, m):
    return ((n + m - 1) // m) * m


# ----------------------------- Pallas kernel ------------------------------ #

def _pocm_kernel(x_ref, slab_ref, out_ref):
    """2-layer MLP + fused (BN-folded) gamma|beta head, single packed slab.

    slab_ref (bf16, lane width W, all row offsets static):
      rows [0, d0)          : w0   [d0, W]  (layer-0 weight, cols 0:d1 real)
      rows [d0, d0+W)       : w1   [W,  W]  (rows 0:d1 real, cols 0:d2 real)
      rows [d0+W, d0+2W)    : wh   [W,  W]  (fused gamma|beta head, BN folded)
      rows [d0+2W, d0+2W+8) : biases: row0=b0, row1=b1, row2=bh, rest zero
    """
    f32 = jnp.float32
    cdt = slab_ref.dtype                 # MXU input dtype (bf16)
    d0 = x_ref.shape[1]
    w = slab_ref.shape[1]
    r1 = d0
    r2 = d0 + w
    rb = d0 + 2 * w

    w0 = slab_ref[0:r1, :]               # static slices of the resident slab
    w1 = slab_ref[r1:r2, :]
    wh = slab_ref[r2:rb, :]
    b0 = slab_ref[rb + 0:rb + 1, :].astype(f32)
    b1 = slab_ref[rb + 1:rb + 2, :].astype(f32)
    bh = slab_ref[rb + 2:rb + 3, :].astype(f32)

    # dense_control_block layer 0: Linear + ReLU (output zero-padded to W lanes)
    h = jnp.dot(x_ref[...].astype(cdt), w0, preferred_element_type=f32) + b0
    h = jnp.maximum(h, 0.0)

    # layer 1: Linear + ReLU  (Dropout = identity in eval; BN folded into head)
    h = jnp.dot(h.astype(cdt), w1, preferred_element_type=f32) + b1
    h = jnp.maximum(h, 0.0)

    # fused gamma|beta head (Identity activations, pocm_norm=None), lane-dense
    out_ref[...] = jnp.dot(h.astype(cdt), wh, preferred_element_type=f32) + bh


# ------------------------------ JAX wrapper -------------------------------- #

@functools.partial(jax.jit, static_argnames=("n_blocks", "internal_channels"))
def pocm_control_forward(x, slab, *, n_blocks, internal_channels):
    """Runs the Pallas kernel; gamma/beta split stays as cheap JAX glue."""
    B, d0 = x.shape
    w = slab.shape[1]
    c = internal_channels
    gdim = n_blocks * c * c
    bdim = n_blocks * c

    # Pad batch to a sublane multiple (and to the batch tile when tiled).
    b_pad = max(8, _round_up(B, 8))
    if b_pad <= _TB_MAX:
        tb = b_pad
    else:
        tb = _TB_MAX
        b_pad = _round_up(b_pad, tb)
    if b_pad != B:
        x = jnp.pad(x, ((0, b_pad - B), (0, 0)))

    n_tiles = b_pad // tb
    out_shape = jax.ShapeDtypeStruct((b_pad, w), jnp.float32)

    if n_tiles == 1:
        # Small-batch path: no grid, both operands fully resident in VMEM.
        out = pl.pallas_call(
            _pocm_kernel,
            out_shape=out_shape,
            in_specs=[pl.BlockSpec(memory_space=pltpu.MemorySpace.VMEM),
                      pl.BlockSpec(memory_space=pltpu.MemorySpace.VMEM)],
            out_specs=pl.BlockSpec(memory_space=pltpu.MemorySpace.VMEM),
        )(x, slab)
    else:
        # Large-batch path: batch-parallel grid (megacore on v7x), slab pinned.
        out = pl.pallas_call(
            _pocm_kernel,
            out_shape=out_shape,
            grid=(n_tiles,),
            in_specs=[pl.BlockSpec((tb, d0), lambda i: (i, 0)),
                      pl.BlockSpec(slab.shape, lambda i: (0, 0))],
            out_specs=pl.BlockSpec((tb, w), lambda i: (i, 0)),
            compiler_params=pltpu.CompilerParams(
                dimension_semantics=("parallel",)),
        )(x, slab)

    out = out[:B]
    # Split fused output: [gamma | beta | zero pad]; reshape once, then index.
    gamma = out[:, :gdim].reshape(B, n_blocks, c, c)
    beta = out[:, gdim:gdim + bdim].reshape(B, n_blocks, c)

    m = n_blocks // 2
    gammas = [[gamma[:, l] for l in range(m)],
              gamma[:, m],
              [gamma[:, l] for l in range(m + 1, n_blocks)]]
    betas = [[beta[:, l] for l in range(m)],
             beta[:, m],
             [beta[:, l] for l in range(m + 1, n_blocks)]]
    return gammas, betas


# --------------------------- parameter creation ----------------------------- #

def _linear_params(key, fan_in, fan_out):
    """PyTorch-style Linear init: U(-1/sqrt(fan_in), 1/sqrt(fan_in)).
    Weight returned already transposed to [in, out]; bias as [1, out]."""
    kw, kb = jax.random.split(key)
    bound = 1.0 / jnp.sqrt(float(fan_in))
    w = jax.random.uniform(kw, (fan_in, fan_out), jnp.float32, -bound, bound)
    b = jax.random.uniform(kb, (1, fan_out), jnp.float32, -bound, bound)
    return w, b


def make_raw_params(key, input_dim, num_layer, n_blocks, internal_channels,
                    scale=2):
    """Raw (un-fused) parameters matching the PyTorch module at init."""
    assert num_layer == 3, "this script instantiates num_layer=3 (2 Linear layers)"
    dims = [input_dim * scale ** i for i in range(num_layer)]  # scale_type='exp'
    c = internal_channels
    k0, k1, kg, kb = jax.random.split(key, 4)
    w0, b0 = _linear_params(k0, dims[0], dims[1])
    w1, b1 = _linear_params(k1, dims[1], dims[2])
    rm = jnp.zeros((1, dims[2]), jnp.float32)    # BatchNorm1d running_mean
    rv = jnp.ones((1, dims[2]), jnp.float32)     # BatchNorm1d running_var
    bn_w = jnp.ones((1, dims[2]), jnp.float32)   # BatchNorm1d affine weight
    bn_b = jnp.zeros((1, dims[2]), jnp.float32)  # BatchNorm1d affine bias
    wg, bg = _linear_params(kg, dims[2], n_blocks * c * c)
    wb, bb = _linear_params(kb, dims[2], n_blocks * c)
    return (w0, b0, w1, b1, rm, rv, bn_w, bn_b, wg, bg, wb, bb)


def prepare_kernel_params(raw_params, eps=1e-5, weight_dtype=jnp.bfloat16):
    """Fold eval-mode BN into the heads, fuse the heads, pack ONE weight slab.

    BN fold (general affine, valid for trained checkpoints):
        s = bn_w / sqrt(rv + eps);  shift = bn_b - rm * s
        head(x) = (h*s + shift) @ W + b = h @ (s.T * W) + (shift @ W + b)
    Slab (bf16): rows [0,d0)=w0 | [d0,d0+W)=w1 | [d0+W,d0+2W)=wh | 8 bias rows,
    every block zero-padded to W=128 lanes.  Done once, outside the hot path.
    """
    (w0, b0, w1, b1, rm, rv, bn_w, bn_b, wg, bg, wb, bb) = raw_params
    d0, d1 = w0.shape
    d2 = w1.shape[1]
    assert d0 % 8 == 0, "input_dim must be a sublane multiple for the slab"

    s = bn_w / jnp.sqrt(rv + eps)                  # [1, d2]
    shift = bn_b - rm * s                          # [1, d2]
    wg_f = s.reshape(-1, 1) * wg                   # [d2, gdim]
    bg_f = bg + shift @ wg                         # [1, gdim]
    wb_f = s.reshape(-1, 1) * wb                   # [d2, bdim]
    bb_f = bb + shift @ wb                         # [1, bdim]

    wh = jnp.concatenate([wg_f, wb_f], axis=1)     # [d2, gdim + bdim]
    bh = jnp.concatenate([bg_f, bb_f], axis=1)     # [1, gdim + bdim]

    W = max(128, _round_up(max(d2, wh.shape[1]), 128))   # slab lane width
    assert d2 <= W

    w0_p = jnp.zeros((d0, W), jnp.float32).at[:, :d1].set(w0)
    w1_p = jnp.zeros((W, W), jnp.float32).at[:d1, :d2].set(w1)
    wh_p = jnp.zeros((W, W), jnp.float32).at[:d2, :wh.shape[1]].set(wh)
    b_p = jnp.zeros((8, W), jnp.float32)
    b_p = b_p.at[0, :d1].set(b0[0])
    b_p = b_p.at[1, :d2].set(b1[0])
    b_p = b_p.at[2, :bh.shape[1]].set(bh[0])

    slab = jnp.concatenate([w0_p, w1_p, wh_p, b_p], axis=0).astype(weight_dtype)
    return slab


# -------------------------- pure-JAX references ----------------------------- #

def reference_forward(x, raw_params, eps=1e-5):
    """f32 reference of the original PyTorch module (eval mode)."""
    (w0, b0, w1, b1, rm, rv, bn_w, bn_b, wg, bg, wb, bb) = raw_params
    h = jnp.maximum(x @ w0 + b0, 0.0)
    h = jnp.maximum(h @ w1 + b1, 0.0)
    h = (h - rm) / jnp.sqrt(rv + eps) * bn_w + bn_b   # BN eval (Dropout = id)
    gamma = h @ wg + bg
    beta = h @ wb + bb
    return gamma, beta


def slab_reference_forward(x, slab):
    """XLA reference replicating the kernel's exact bf16/f32 arithmetic."""
    f32 = jnp.float32
    cdt = slab.dtype
    d0 = x.shape[1]
    w = slab.shape[1]
    w0 = slab[0:d0]
    w1 = slab[d0:d0 + w]
    wh = slab[d0 + w:d0 + 2 * w]
    b = slab[d0 + 2 * w:d0 + 2 * w + 3].astype(f32)
    h = jnp.maximum(jnp.dot(x.astype(cdt), w0, preferred_element_type=f32)
                    + b[0:1], 0.0)
    h = jnp.maximum(jnp.dot(h.astype(cdt), w1, preferred_element_type=f32)
                    + b[1:2], 0.0)
    return jnp.dot(h.astype(cdt), wh, preferred_element_type=f32) + b[2:3]


# ---------------------------------- main ------------------------------------ #

if __name__ == "__main__":
    B = 8                 # batch
    INPUT_DIM = 32        # dense_control_block input_dim
    NUM_LAYER = 3         # dims = [32, 64, 128]
    N_BLOCKS = 6
    C = 4                 # internal_channels

    key = jax.random.PRNGKey(0)
    kx, kp = jax.random.split(key)
    x = jax.random.normal(kx, (B, INPUT_DIM), jnp.float32)

    raw_params = make_raw_params(kp, INPUT_DIM, NUM_LAYER, N_BLOCKS, C)
    slab = prepare_kernel_params(raw_params)

    gammas, betas = pocm_control_forward(
        x, slab, n_blocks=N_BLOCKS, internal_channels=C)
    jax.block_until_ready(jax.tree_util.tree_leaves((gammas, betas)))

    # Structural checks (matches PyTorch [enc_list, middle, dec_list] layout).
    m = N_BLOCKS // 2
    assert len(gammas[0]) == m and gammas[1].shape == (B, C, C)
    assert len(gammas[2]) == N_BLOCKS - m - 1
    assert len(betas[0]) == m and betas[1].shape == (B, C)
    assert len(betas[2]) == N_BLOCKS - m - 1

    gamma_got = jnp.concatenate(
        [g.reshape(B, C * C) for g in (gammas[0] + [gammas[1]] + gammas[2])],
        axis=1)
    beta_got = jnp.concatenate(betas[0] + [betas[1]] + betas[2], axis=1)

    # 1) Tight check against an XLA reference using the identical bf16 math.
    gdim, bdim = N_BLOCKS * C * C, N_BLOCKS * C
    matched = slab_reference_forward(x, slab)
    assert jnp.allclose(gamma_got, matched[:, :gdim], atol=1e-3, rtol=1e-3)
    assert jnp.allclose(beta_got, matched[:, gdim:gdim + bdim],
                        atol=1e-3, rtol=1e-3)

    # 2) Semantics check against the full-f32 reference of the original module
    #    (tolerance accounts for bf16 weight storage with f32 accumulation).
    gamma_ref, beta_ref = reference_forward(x, raw_params)
    assert jnp.allclose(gamma_got, gamma_ref, atol=3e-2, rtol=3e-2)
    assert jnp.allclose(beta_got, beta_ref, atol=3e-2, rtol=3e-2)

    print("KERNEL_OK")
</pallas_src>

<mosaic_0001>
module attributes {stable_mosaic.version = 11 : i64} {
  func.func @_pocm_kernel(%arg0: memref<8x32xf32, #tpu.memory_space<vmem>>, %arg1: memref<296x128xbf16, #tpu.memory_space<vmem>>, %arg2: memref<8x128xf32, #tpu.memory_space<vmem>>) attributes {dimension_semantics = [], scalar_prefetch = 0 : i64, scratch_operands = 0 : i64, tpu.core_type = #tpu.core_type<tc>} {
    %c0 = arith.constant 0 : index
    %c0_0 = arith.constant 0 : index
    %0 = vector.load %arg1[%c0, %c0_0] : memref<296x128xbf16, #tpu.memory_space<vmem>>, vector<32x128xbf16>
    %c32 = arith.constant 32 : index
    %c0_1 = arith.constant 0 : index
    %1 = vector.load %arg1[%c32, %c0_1] : memref<296x128xbf16, #tpu.memory_space<vmem>>, vector<128x128xbf16>
    %c160 = arith.constant 160 : index
    %c0_2 = arith.constant 0 : index
    %2 = vector.load %arg1[%c160, %c0_2] : memref<296x128xbf16, #tpu.memory_space<vmem>>, vector<128x128xbf16>
    %c288 = arith.constant 288 : index
    %c0_3 = arith.constant 0 : index
    %3 = vector.load %arg1[%c288, %c0_3] : memref<296x128xbf16, #tpu.memory_space<vmem>>, vector<1x128xbf16>
    %4 = arith.extf %3 : vector<1x128xbf16> to vector<1x128xf32>
    %c289 = arith.constant 289 : index
    %c0_4 = arith.constant 0 : index
    %5 = vector.load %arg1[%c289, %c0_4] : memref<296x128xbf16, #tpu.memory_space<vmem>>, vector<1x128xbf16>
    %6 = arith.extf %5 : vector<1x128xbf16> to vector<1x128xf32>
    %c290 = arith.constant 290 : index
    %c0_5 = arith.constant 0 : index
    %7 = vector.load %arg1[%c290, %c0_5] : memref<296x128xbf16, #tpu.memory_space<vmem>>, vector<1x128xbf16>
    %8 = arith.extf %7 : vector<1x128xbf16> to vector<1x128xf32>
    %c0_6 = arith.constant 0 : index
    %c0_7 = arith.constant 0 : index
    %9 = vector.load %arg0[%c0_6, %c0_7] : memref<8x32xf32, #tpu.memory_space<vmem>>, vector<8x32xf32>
    %10 = arith.truncf %9 : vector<8x32xf32> to vector<8x32xbf16>
    %cst = arith.constant dense<0.000000e+00> : vector<8x128xf32>
    %11 = tpu.matmul %10, %0, %cst {dimension_numbers = #tpu.dot_dimension_numbers<[1], [0], [0], [1], [0, 0, 1, 1], [], []>} : vector<8x32xbf16>, vector<32x128xbf16>, vector<8x128xf32> -> vector<8x128xf32>
    %12 = vector.broadcast %4 : vector<1x128xf32> to vector<8x128xf32>
    %13 = arith.addf %11, %12 : vector<8x128xf32>
    %cst_8 = arith.constant 0.000000e+00 : f32
    %14 = vector.broadcast %cst_8 : f32 to vector<8x128xf32>
    %15 = arith.maximumf %13, %14 : vector<8x128xf32>
    %16 = arith.truncf %15 : vector<8x128xf32> to vector<8x128xbf16>
    %cst_9 = arith.constant dense<0.000000e+00> : vector<8x128xf32>
    %17 = tpu.matmul %16, %1, %cst_9 {dimension_numbers = #tpu.dot_dimension_numbers<[1], [0], [0], [1], [0, 0, 1, 1], [], []>} : vector<8x128xbf16>, vector<128x128xbf16>, vector<8x128xf32> -> vector<8x128xf32>
    %18 = vector.broadcast %6 : vector<1x128xf32> to vector<8x128xf32>
    %19 = arith.addf %17, %18 : vector<8x128xf32>
    %cst_10 = arith.constant 0.000000e+00 : f32
    %20 = vector.broadcast %cst_10 : f32 to vector<8x128xf32>
    %21 = arith.maximumf %19, %20 : vector<8x128xf32>
    %22 = arith.truncf %21 : vector<8x128xf32> to vector<8x128xbf16>
    %cst_11 = arith.constant dense<0.000000e+00> : vector<8x128xf32>
    %23 = tpu.matmul %22, %2, %cst_11 {dimension_numbers = #tpu.dot_dimension_numbers<[1], [0], [0], [1], [0, 0, 1, 1], [], []>} : vector<8x128xbf16>, vector<128x128xbf16>, vector<8x128xf32> -> vector<8x128xf32>
    %24 = vector.broadcast %8 : vector<1x128xf32> to vector<8x128xf32>
    %25 = arith.addf %23, %24 : vector<8x128xf32>
    %c0_12 = arith.constant 0 : index
    %c0_13 = arith.constant 0 : index
    %26 = vector.load %arg2[%c0_12, %c0_13] : memref<8x128xf32, #tpu.memory_space<vmem>>, vector<8x128xf32>
    tpu.vector_store %arg2[%c0_12, %c0_13], %25 {strides = array<i32>} : memref<8x128xf32, #tpu.memory_space<vmem>>, vector<8x128xf32>,
    return
  }
}

</mosaic_0001>

<bundles_post_ra>
// kernel: pocm_control_forward.1
= control target key start
LH: loop header
LB: loop body
LE: loop exit
PB: predicated region body
PF: predicated region fallthrough
CT: control target
= control target key end

     0   :  { %7 = vsyncpa [#allocation3], 0  ;;  %s574_s0 = inlined_call_operand.hbm [shape: f32[8,32], index: 0, kind: input, shape index: {}]   ;;  %s575_s1 = inlined_call_operand.hbm [shape: bf16[296,128], index: 1, kind: input, shape index: {}]   ;;  %s576_s2 = inlined_call_operand.vmem [shape: f32[8,128], index: 2, kind: output, shape index: {}]  }
   0x1   :  { %8 = vsyncpa [#allocation5], 0  ;;  %s495_s9 = smov [#allocation2]   ;;  %s496_s11 = smov [#allocation4]  }
   0x2   :  { %s15_s10 = sshll.u32 %s495_s9, 4  ;;  %s24_s12 = sshll.u32 %s496_s11, 4  ;;  %s16_s10 = int_to_ptr.vmem [resolvable:$true] %s15_s10  ;;  %s516_s12 = int_to_ptr.vmem [resolvable:$true] %s24_s12 }
   0x3   :  { %s447_s15 = scalar_lea.hbm %s574_s0, 128 }
   0x4   :  { %p448_p0 = scmp.ne.s32.totalorder %s574_s0, %s447_s15  ;;  %p451_p1 = scmp.lt.u32.totalorder %s447_s15, %s574_s0 }
   0x6   :  { %p453_p2 = pnand %p451_p1, %p448_p0 }
   0x8   :  { %456 = shalt.err (!%p453_p2)
}
   0x9   :  { %s457_s20 = scalar_lea.vmem %s16_s10, 128  ;;  %p462_p4 = scmp.lt.s32.totalorder %s16_s10, %s16_s10 }
   0xa   :  { %p458_p3 = scmp.ne.s32.totalorder %s16_s10, %s457_s20  ;;  %p463_p5 = scmp.lt.s32.totalorder %s457_s20, %s457_s20 }
   0xc   :  { %p464_p6 = por %p463_p5, %p462_p4 }
   0xe   :  { %p465_p7 = pnand %p464_p6, %p458_p3 }
  0x10   :  { %468 = shalt.err (!%p465_p7)
}
  0x11   :  { %18 = dma.hbm_to_vmem [thread:$0]  %s574_s0, 128, %s16_s10, [#allocation3]  }
  0x12   :  { %s469_s25 = scalar_lea.hbm %s575_s1, 2368 }
  0x13   :  { %p470_p8 = scmp.ne.s32.totalorder %s575_s1, %s469_s25  ;;  %p473_p9 = scmp.lt.u32.totalorder %s469_s25, %s575_s1 }
  0x15   :  { %p475_p10 = pnand %p473_p9, %p470_p8 }
  0x17   :  { %478 = shalt.err (!%p475_p10)
}
  0x18   :  { %s479_s30 = scalar_lea.vmem %s516_s12, 2368  ;;  %p484_p12 = scmp.lt.s32.totalorder %s516_s12, %s516_s12 }
  0x19   :  { %p480_p11 = scmp.ne.s32.totalorder %s516_s12, %s479_s30  ;;  %p485_p13 = scmp.lt.s32.totalorder %s479_s30, %s479_s30 }
  0x1b   :  { %p486_p0 = por %p485_p13, %p484_p12 }
  0x1d   :  { %p487_p1 = pnand %p486_p0, %p480_p11 }
  0x1f   :  { %490 = shalt.err (!%p487_p1)
}
  0x20   :  { %s497_s0 = smov 64   ;;  %s498_s3 = smov 4  }
  0x21   :  { %30 = dma.hbm_to_vmem [thread:$0]  %s575_s1, 2368, %s516_s12, [#allocation5], %s497_s0, %s497_s0, %s498_s3  }
  0x22   :  { %491 = dma.done.wait [#allocation3], 128  }
  0x23   :  { %492 = vsyncadd [#allocation3], 4294967168 }
  0x24   :  { %493 = dma.done.wait [#allocation5], 2368  }
  0x25   :  { %494 = vsyncadd [#allocation5], 4294964928  ;;  %v499_v0 = vmov 0.0   ;;  %vm500_vm0 = vmmov 0   ;;  %v429_v1 = vld [vmem:[#allocation4] sm:$0xff]   ;;  %v430_v2 = vld [vmem:[#allocation4 + $0x8] sm:$0xff]   ;;  %v80_v19 = vlaneseq }
  0x26   :  { %375 = vmatprep.subr.bf16.mxu0 %v499_v0  ;;  %379 = vmatprep.mubr.msk.bf16.mxu0 %vm500_vm0, %v499_v0  ;;  %v78_v3 = vld [vmem:[#allocation2] sm:$0xff]  ;;  %v431_v4 = vld [vmem:[#allocation4 + $0x10] sm:$0xff]   ;;  %vm96_vm1 = vcmask 261120   ;;  %v433_v7 = vld [vmem:[#allocation4 + $0x20] sm:$0xff]  }
  0x27   :  { %383 = vmatprep.subr.bf16.mxu1 %v499_v0  ;;  %399 = vmatprep.mubr.msk.bf16.mxu1 %vm500_vm0, %v499_v0  ;;  %v79_v5 = vpack.c.bf16 %v78_v3, %v78_v3  ;;  %v432_v6 = vld [vmem:[#allocation4 + $0x18] sm:$0xff]   ;;  %v434_v8 = vld [vmem:[#allocation4 + $0x28] sm:$0xff]   ;;  %v435_v9 = vld [vmem:[#allocation4 + $0x30] sm:$0xff]   ;;  %v81_v20 = vshrl.u32 %v80_v19, 7 }
  0x28   :  { %376 = vmatpush3.bf16.msra.mxu0 %v429_v1  ;;  %384 = vmatpush3.bf16.msra.mxu1 %v431_v4  ;;  %v436_v10 = vld [vmem:[#allocation4 + $0x38] sm:$0xff]   ;;  %v437_v11 = vld [vmem:[#allocation4 + $0x40] sm:$0xff]   ;;  %v438_v12 = vld [vmem:[#allocation4 + $0x48] sm:$0xff]  }
  0x29   :  { %377 = vmatprep.subr.bf16.mxu0 %v499_v0  ;;  %385 = vmatprep.subr.bf16.mxu1 %v499_v0  ;;  %v439_v13 = vld [vmem:[#allocation4 + $0x50] sm:$0xff]   ;;  %v440_v14 = vld [vmem:[#allocation4 + $0x58] sm:$0xff]   ;;  %v441_v15 = vld [vmem:[#allocation4 + $0x60] sm:$0xff]   ;;  %v82_v23 = vsub.s32 0, %v81_v20  ;;  %v144_v34 = vsub.s32 1, %v81_v20  ;;  %v238_v45 = vsub.s32 2, %v81_v20 }
  0x2a   :  { %v442_v16 = vld [vmem:[#allocation4 + $0x68] sm:$0xff]   ;;  %v443_v17 = vld [vmem:[#allocation4 + $0x70] sm:$0xff]   ;;  %v444_v18 = vld [vmem:[#allocation4 + $0x78] sm:$0xff]  }
  0x2b   :  { %v74_v21 = vld [vmem:[#allocation4 + $0x90] sm:$0x1]  ;;  %v445_v32 = vld [vmem:[#allocation4 + $0x80] sm:$0xff]   ;;  %v446_v33 = vld [vmem:[#allocation4 + $0x88] sm:$0xff]  }
  0x2c   :  { %378 = vmatpush3.bf16.msra.mxu0 %v430_v2  ;;  %386 = vmatpush3.bf16.msra.mxu1 %v432_v6  ;;  %v75_v22 = vunpack.c.l.bf16 %v74_v21  ;;  %v76_v43 = vld [vmem:[#allocation4 + $0x90] sm:$0x2] }
  0x2d   :  { %403 = vmatprep.subr.bf16.mxu0 %v499_v0  ;;  %387 = vmatprep.subr.bf16.mxu1 %v499_v0  ;;  %v77_v44 = vunpack.c.l.bf16 %v76_v43 }
  0x2e   :  { %v83_v24 = vrot.slane %v75_v22, %v82_v23  ;;  %v145_v35 = vrot.slane %v75_v22, %v144_v34 }
  0x2f   :  { %380 = vmatmul.mubr.msk.bf16.vlgmr.msra.gmra.mrb[0].mxu0 %vm96_vm1, %v79_v5  ;;  %v239_v46 = vrot.slane %v77_v44, %v238_v45 }
  0x30   :  { %419 = vmatprep.mubr.msk.bf16.mxu0 %vm500_vm0, %v499_v0  ;;  %388 = vmatpush3.bf16.msra.mxu1 %v433_v7 }
  0x31   :  { %389 = vmatprep.subr.bf16.mxu1 %v499_v0  ;;  %404 = vmatpush3.bf16.msra.mxu0 %v439_v13 }
  0x32   :  { %405 = vmatprep.subr.bf16.mxu0 %v499_v0 }
  0x34   :  { %390 = vmatpush3.bf16.msra.mxu1 %v434_v8 }
  0x35   :  { %391 = vmatprep.subr.bf16.mxu1 %v499_v0  ;;  %406 = vmatpush3.bf16.msra.mxu0 %v440_v14 }
  0x36   :  { %407 = vmatprep.subr.bf16.mxu0 %v499_v0 }
  0x38   :  { %392 = vmatpush3.bf16.msra.mxu1 %v435_v9 }
  0x39   :  { %393 = vmatprep.subr.bf16.mxu1 %v499_v0  ;;  %408 = vmatpush3.bf16.msra.mxu0 %v441_v15 }
  0x3a   :  { %409 = vmatprep.subr.bf16.mxu0 %v499_v0 }
  0x3c   :  { %394 = vmatpush3.bf16.msra.mxu1 %v436_v10 }
  0x3d   :  { %395 = vmatprep.subr.bf16.mxu1 %v499_v0  ;;  %410 = vmatpush3.bf16.msra.mxu0 %v442_v16 }
  0x3e   :  { %411 = vmatprep.subr.bf16.mxu0 %v499_v0 }
  0x40   :  { %396 = vmatpush3.bf16.msra.mxu1 %v437_v11 }
  0x41   :  { %397 = vmatprep.subr.bf16.mxu1 %v499_v0  ;;  %412 = vmatpush3.bf16.msra.mxu0 %v443_v17 }
  0x42   :  { %413 = vmatprep.subr.bf16.mxu0 %v499_v0 }
  0x44   :  { %398 = vmatpush3.bf16.msra.mxu1 %v438_v12 }
  0x45   :  { %414 = vmatpush3.bf16.msra.mxu0 %v444_v18 }
  0x46   :  { %415 = vmatprep.subr.bf16.mxu0 %v499_v0 }
  0x49   :  { %416 = vmatpush3.bf16.msra.mxu0 %v445_v32 }
  0x4a   :  { %417 = vmatprep.subr.bf16.mxu0 %v499_v0 }
  0x4d   :  { %418 = vmatpush3.bf16.msra.mxu0 %v446_v33 }
 0x102   :  { %v134_v25 = vpop.f32.mrb[0].mxu0 }
 0x103   :  { %v135_v26 = vadd.f32 %v134_v25, %v83_v24  ;;  %v381_v27 = vpop.f32.mrb[1].mxu0 }
 0x104   :  { %v137_v28 = vpop.f32.mrb[2].mxu0 }
 0x105   :  { %v140_v29 = vmax.f32 %v135_v26, 0.0  ;;  %v382_v30 = vpop.f32.mrb[3].mxu0 }
 0x107   :  { %v141_v31 = vpack.c.bf16 %v140_v29, %v140_v29 }
 0x109   :  { %400 = vmatmul.mubr.bf16.vlgmr.msra.gmra.mrb[0].mxu1 %v141_v31 }
 0x1dc   :  { %v228_v36 = vpop.f32.mrb[0].mxu1 }
 0x1dd   :  { %v229_v37 = vadd.f32 %v228_v36, %v145_v35  ;;  %v401_v38 = vpop.f32.mrb[1].mxu1 }
 0x1de   :  { %v231_v39 = vpop.f32.mrb[2].mxu1 }
 0x1df   :  { %v234_v40 = vmax.f32 %v229_v37, 0.0  ;;  %v402_v41 = vpop.f32.mrb[3].mxu1 }
 0x1e1   :  { %v235_v42 = vpack.c.bf16 %v234_v40, %v234_v40 }
 0x1e3   :  { %420 = vmatmul.mubr.bf16.vlgmr.msra.gmra.mrb[4].mxu0 %v235_v42 }
 0x2b6   :  { %v322_v47 = vpop.f32.mrb[4].mxu0 }
 0x2b7   :  { %v323_v48 = vadd.f32 %v322_v47, %v239_v46  ;;  %v421_v49 = vpop.f32.mrb[5].mxu0 }
 0x2b8   :  { %v325_v50 = vpop.f32.mrb[6].mxu0 }
 0x2b9   :  { %328 = vst [vmem:[%s576_s2] sm:$0xff] %v323_v48  ;;  %v422_v51 = vpop.f32.mrb[7].mxu0 }
 0x2ba   :  { %333 = vsyncpa [#allocation3], 1 }
 0x2bb   :  { %334 = vsyncpa [#allocation5], 1 }

</bundles_post_ra>
